<compile_context>
chip_gen: v6e
topology: v6e:2x2x1
jax: 0.10.0
libtpu: 0.0.40
codegen_flags: <defaults>
</compile_context>

<pallas_src>
import jax
import jax.numpy as jnp
from jax.experimental import pallas as pl
from jax.experimental.pallas import tpu as pltpu


def _round_up(x, m):
    return (x + m - 1) // m * m


def dqn_kernel(x_ref, w1_ref, b1_ref, w2_ref, b2_ref, wq_ref, bq_ref, q_ref):
    cdt = w1_ref.dtype                      # compute dtype (f32 or bf16)
    x = x_ref[...].astype(cdt)              # cast streamed tile in-VMEM (VPU, free)
    # fc1 + ReLU: f32 accumulation, f32 epilogue (activations are kernel-local).
    h1 = jnp.dot(x, w1_ref[...], preferred_element_type=jnp.float32) + b1_ref[...]
    h1 = jnp.maximum(h1, 0.0).astype(cdt)
    # fc2 + ReLU
    h2 = jnp.dot(h1, w2_ref[...], preferred_element_type=jnp.float32) + b2_ref[...]
    h2 = jnp.maximum(h2, 0.0).astype(cdt)
    # q head (no activation)
    q = jnp.dot(h2, wq_ref[...], preferred_element_type=jnp.float32) + bq_ref[...]
    q_ref[...] = q.astype(q_ref.dtype)


def prepare_params(params, compute_dtype=jnp.float32):
    """One-time (per parameter update) preparation: weight dtype cast + bias
    reshape to (1, out). Keep this OUT of the hot forward path so the forward
    launches exactly one kernel. Biases stay f32 (epilogue runs on the f32
    accumulator)."""
    out = {}
    for k in ("w1", "w2", "wq"):
        out[k] = params[k].astype(compute_dtype)
    for k in ("b1", "b2", "bq"):
        out[k] = params[k].reshape(1, -1).astype(jnp.float32)
    return out


def dqn_forward(state, params, *, block_b=512):
    """state: (B, state_dim). params: output of prepare_params (weights (in,out),
    biases (1,out)). Returns Q: (B, action_dim) float32."""
    w1, b1 = params["w1"], params["b1"]
    w2, b2 = params["w2"], params["b2"]
    wq, bq = params["wq"], params["bq"]

    B, S = state.shape
    F1 = w1.shape[1]
    F2 = w2.shape[1]
    A = wq.shape[1]

    if B == 0:
        return jnp.zeros((0, A), jnp.float32)

    # Batch tile: multiple of 8 (sublane), at least 2 grid steps for moderate B
    # so both v7x TensorCores get work; partial last tile is masked by Pallas.
    TB = max(8, min(block_b, _round_up(pl.cdiv(B, 2), 8)))
    grid = (pl.cdiv(B, TB),)

    wbytes = jnp.dtype(w1.dtype).itemsize
    sbytes = jnp.dtype(state.dtype).itemsize
    flops = 2 * B * (S * F1 + F1 * F2 + F2 * A)
    bytes_accessed = int(state.nbytes + w1.nbytes + w2.nbytes + wq.nbytes
                         + b1.nbytes + b2.nbytes + bq.nbytes + B * A * 4)

    # Explicit VMEM budget: streamed tiles + resident weights are double-buffered
    # by the BlockSpec pipeline; add slack for kernel-local activations. Matters
    # mostly if the MLP is scaled up (v7x VMEM = 64 MiB physical).
    est = (2 * (TB * S * sbytes + TB * A * 4)
           + 2 * ((S * F1 + F1 * F2 + F2 * A) * wbytes + (F1 + F2 + A) * 4)
           + 4 * TB * max(F1, F2) * 4)
    vmem_limit = int(min(64 << 20, max(32 << 20, 2 * est)))

    return pl.pallas_call(
        dqn_kernel,
        out_shape=jax.ShapeDtypeStruct((B, A), jnp.float32),
        grid_spec=pltpu.PrefetchScalarGridSpec(
            num_scalar_prefetch=0,
            grid=grid,
            in_specs=[
                pl.BlockSpec((TB, S), lambda i: (i, 0)),   # state tile (streamed)
                pl.BlockSpec((S, F1), lambda i: (0, 0)),   # weights: VMEM-resident
                pl.BlockSpec((1, F1), lambda i: (0, 0)),
                pl.BlockSpec((F1, F2), lambda i: (0, 0)),
                pl.BlockSpec((1, F2), lambda i: (0, 0)),
                pl.BlockSpec((F2, A), lambda i: (0, 0)),
                pl.BlockSpec((1, A), lambda i: (0, 0)),
            ],
            out_specs=pl.BlockSpec((TB, A), lambda i: (i, 0)),
        ),
        compiler_params=pltpu.CompilerParams(
            dimension_semantics=("parallel",),   # v7x: shard batch tiles over 2 TCs
            vmem_limit_bytes=vmem_limit,
        ),
        cost_estimate=pl.CostEstimate(
            flops=flops, transcendentals=0, bytes_accessed=bytes_accessed),
    )(state, w1, b1, w2, b2, wq, bq)


def init_params(key, state_dim, action_dim, fc1_dim, fc2_dim):
    """Deterministic init mimicking nn.Linear's uniform(-1/sqrt(fan_in), +).
    Weights stored (in, out) so the kernel computes x @ W."""
    keys = jax.random.split(key, 6)

    def linear(kw, kb, fan_in, fan_out):
        bound = 1.0 / jnp.sqrt(jnp.float32(fan_in))
        w = jax.random.uniform(kw, (fan_in, fan_out), jnp.float32, -bound, bound)
        b = jax.random.uniform(kb, (fan_out,), jnp.float32, -bound, bound)
        return w, b

    w1, b1 = linear(keys[0], keys[1], state_dim, fc1_dim)
    w2, b2 = linear(keys[2], keys[3], fc1_dim, fc2_dim)
    wq, bq = linear(keys[4], keys[5], fc2_dim, action_dim)
    return {"w1": w1, "b1": b1, "w2": w2, "b2": b2, "wq": wq, "bq": bq}


def dqn_forward_ref(state, p):
    h1 = jnp.maximum(state @ p["w1"] + p["b1"].reshape(1, -1), 0.0)
    h2 = jnp.maximum(h1 @ p["w2"] + p["b2"].reshape(1, -1), 0.0)
    return h2 @ p["wq"] + p["bq"].reshape(1, -1)


# TODO(synk): optimizer (Adam) and save/load_checkpoint are training/IO utilities
# with no Pallas forward-pass equivalent; only forward() is implemented here.

if __name__ == "__main__":
    # Small shapes consistent with the module's forward.
    batch = 2
    state_dim = 8
    fc1_dim = 32
    fc2_dim = 32
    action_dim = 4

    key = jax.random.PRNGKey(0)
    k_params, k_state, k_big = jax.random.split(key, 3)
    params = init_params(k_params, state_dim, action_dim, fc1_dim, fc2_dim)

    # f32 compute path (tight tolerance).
    p_f32 = prepare_params(params, jnp.float32)

    # 1) Tiny batch (single grid step).
    state = jax.random.normal(k_state, (batch, state_dim), jnp.float32)
    q = jax.block_until_ready(dqn_forward(state, p_f32))
    q_ref = dqn_forward_ref(state, params)
    assert q.shape == (batch, action_dim)
    assert jnp.allclose(q, q_ref, atol=1e-5, rtol=1e-5), "mismatch vs reference (small)"

    # 2) Larger, non-multiple batch: multi-step grid + masked partial last tile.
    big_b = 260
    state_big = jax.random.normal(k_big, (big_b, state_dim), jnp.float32)
    q_big = jax.block_until_ready(dqn_forward(state_big, p_f32, block_b=128))
    q_big_ref = dqn_forward_ref(state_big, params)
    assert q_big.shape == (big_b, action_dim)
    assert jnp.allclose(q_big, q_big_ref, atol=1e-5, rtol=1e-5), "mismatch vs reference (tiled)"

    # 3) bf16 compute path (v6e/v7x MXU-native); relaxed tolerance as documented.
    p_bf16 = prepare_params(params, jnp.bfloat16)
    q_bf = jax.block_until_ready(dqn_forward(state_big, p_bf16, block_b=128))
    assert q_bf.shape == (big_b, action_dim)
    assert jnp.allclose(q_bf, q_big_ref, atol=5e-2, rtol=5e-2), "mismatch vs reference (bf16)"

    print("KERNEL_OK")
</pallas_src>

<mosaic_0001>
module attributes {stable_mosaic.version = 11 : i64} {
  func.func @dqn_kernel(%arg0: i32, %arg1: memref<8x8xf32, #tpu.memory_space<vmem>>, %arg2: memref<8x32xf32, #tpu.memory_space<vmem>>, %arg3: memref<1x32xf32, #tpu.memory_space<vmem>>, %arg4: memref<32x32xf32, #tpu.memory_space<vmem>>, %arg5: memref<1x32xf32, #tpu.memory_space<vmem>>, %arg6: memref<32x4xf32, #tpu.memory_space<vmem>>, %arg7: memref<1x4xf32, #tpu.memory_space<vmem>>, %arg8: memref<8x4xf32, #tpu.memory_space<vmem>>) attributes {dimension_semantics = [#tpu.dimension_semantics<parallel>], iteration_bounds = array<i64: 1>, scalar_prefetch = 0 : i64, scratch_operands = 0 : i64, tpu.core_type = #tpu.core_type<tc>, window_params = [{transform_indices = @transform_0, window_bounds = array<i64: 8, 8>}, {pipeline_mode = #tpu.pipeline_mode<synchronous>, transform_indices = @transform_1, window_bounds = array<i64: 8, 32>}, {pipeline_mode = #tpu.pipeline_mode<synchronous>, transform_indices = @transform_2, window_bounds = array<i64: 1, 32>}, {pipeline_mode = #tpu.pipeline_mode<synchronous>, transform_indices = @transform_3, window_bounds = array<i64: 32, 32>}, {pipeline_mode = #tpu.pipeline_mode<synchronous>, transform_indices = @transform_4, window_bounds = array<i64: 1, 32>}, {pipeline_mode = #tpu.pipeline_mode<synchronous>, transform_indices = @transform_5, window_bounds = array<i64: 32, 4>}, {pipeline_mode = #tpu.pipeline_mode<synchronous>, transform_indices = @transform_6, window_bounds = array<i64: 1, 4>}, {transform_indices = @transform_7, window_bounds = array<i64: 8, 4>}]} {
    %c0 = arith.constant 0 : index
    %c0_0 = arith.constant 0 : index
    %0 = vector.load %arg1[%c0, %c0_0] : memref<8x8xf32, #tpu.memory_space<vmem>>, vector<8x8xf32>
    %c0_1 = arith.constant 0 : index
    %c0_2 = arith.constant 0 : index
    %1 = vector.load %arg2[%c0_1, %c0_2] : memref<8x32xf32, #tpu.memory_space<vmem>>, vector<8x32xf32>
    %cst = arith.constant dense<0.000000e+00> : vector<8x32xf32>
    %2 = tpu.matmul %0, %1, %cst {dimension_numbers = #tpu.dot_dimension_numbers<[1], [0], [0], [1], [0, 0, 1, 1], [], []>} : vector<8x8xf32>, vector<8x32xf32>, vector<8x32xf32> -> vector<8x32xf32>
    %c0_3 = arith.constant 0 : index
    %c0_4 = arith.constant 0 : index
    %3 = vector.load %arg3[%c0_3, %c0_4] : memref<1x32xf32, #tpu.memory_space<vmem>>, vector<1x32xf32>
    %4 = vector.broadcast %3 : vector<1x32xf32> to vector<8x32xf32>
    %5 = arith.addf %2, %4 : vector<8x32xf32>
    %cst_5 = arith.constant 0.000000e+00 : f32
    %6 = vector.broadcast %cst_5 : f32 to vector<8x32xf32>
    %7 = arith.maximumf %5, %6 : vector<8x32xf32>
    %c0_6 = arith.constant 0 : index
    %c0_7 = arith.constant 0 : index
    %8 = vector.load %arg4[%c0_6, %c0_7] : memref<32x32xf32, #tpu.memory_space<vmem>>, vector<32x32xf32>
    %cst_8 = arith.constant dense<0.000000e+00> : vector<8x32xf32>
    %9 = tpu.matmul %7, %8, %cst_8 {dimension_numbers = #tpu.dot_dimension_numbers<[1], [0], [0], [1], [0, 0, 1, 1], [], []>} : vector<8x32xf32>, vector<32x32xf32>, vector<8x32xf32> -> vector<8x32xf32>
    %c0_9 = arith.constant 0 : index
    %c0_10 = arith.constant 0 : index
    %10 = vector.load %arg5[%c0_9, %c0_10] : memref<1x32xf32, #tpu.memory_space<vmem>>, vector<1x32xf32>
    %11 = vector.broadcast %10 : vector<1x32xf32> to vector<8x32xf32>
    %12 = arith.addf %9, %11 : vector<8x32xf32>
    %cst_11 = arith.constant 0.000000e+00 : f32
    %13 = vector.broadcast %cst_11 : f32 to vector<8x32xf32>
    %14 = arith.maximumf %12, %13 : vector<8x32xf32>
    %c0_12 = arith.constant 0 : index
    %c0_13 = arith.constant 0 : index
    %15 = vector.load %arg6[%c0_12, %c0_13] : memref<32x4xf32, #tpu.memory_space<vmem>>, vector<32x4xf32>
    %cst_14 = arith.constant dense<0.000000e+00> : vector<8x4xf32>
    %16 = tpu.matmul %14, %15, %cst_14 {dimension_numbers = #tpu.dot_dimension_numbers<[1], [0], [0], [1], [0, 0, 1, 1], [], []>} : vector<8x32xf32>, vector<32x4xf32>, vector<8x4xf32> -> vector<8x4xf32>
    %c0_15 = arith.constant 0 : index
    %c0_16 = arith.constant 0 : index
    %17 = vector.load %arg7[%c0_15, %c0_16] : memref<1x4xf32, #tpu.memory_space<vmem>>, vector<1x4xf32>
    %18 = vector.broadcast %17 : vector<1x4xf32> to vector<8x4xf32>
    %19 = arith.addf %16, %18 : vector<8x4xf32>
    %c0_17 = arith.constant 0 : index
    %c0_18 = arith.constant 0 : index
    %20 = vector.load %arg8[%c0_17, %c0_18] : memref<8x4xf32, #tpu.memory_space<vmem>>, vector<8x4xf32>
    tpu.vector_store %arg8[%c0_17, %c0_18], %19 {strides = array<i32>} : memref<8x4xf32, #tpu.memory_space<vmem>>, vector<8x4xf32>,
    return
  }
  func.func @transform_0(%arg0: i32) -> (i32, i32) {
    %c0_i32 = arith.constant 0 : i32
    %c0_i32_0 = arith.constant 0 : i32
    return %arg0, %c0_i32 : i32, i32
  }
  func.func @transform_1(%arg0: i32) -> (i32, i32) {
    %c0_i32 = arith.constant 0 : i32
    %c0_i32_0 = arith.constant 0 : i32
    %c0_i32_1 = arith.constant 0 : i32
    return %c0_i32, %c0_i32_0 : i32, i32
  }
  func.func @transform_2(%arg0: i32) -> (i32, i32) {
    %c0_i32 = arith.constant 0 : i32
    %c0_i32_0 = arith.constant 0 : i32
    %c0_i32_1 = arith.constant 0 : i32
    return %c0_i32, %c0_i32_0 : i32, i32
  }
  func.func @transform_3(%arg0: i32) -> (i32, i32) {
    %c0_i32 = arith.constant 0 : i32
    %c0_i32_0 = arith.constant 0 : i32
    %c0_i32_1 = arith.constant 0 : i32
    return %c0_i32, %c0_i32_0 : i32, i32
  }
  func.func @transform_4(%arg0: i32) -> (i32, i32) {
    %c0_i32 = arith.constant 0 : i32
    %c0_i32_0 = arith.constant 0 : i32
    %c0_i32_1 = arith.constant 0 : i32
    return %c0_i32, %c0_i32_0 : i32, i32
  }
  func.func @transform_5(%arg0: i32) -> (i32, i32) {
    %c0_i32 = arith.constant 0 : i32
    %c0_i32_0 = arith.constant 0 : i32
    %c0_i32_1 = arith.constant 0 : i32
    return %c0_i32, %c0_i32_0 : i32, i32
  }
  func.func @transform_6(%arg0: i32) -> (i32, i32) {
    %c0_i32 = arith.constant 0 : i32
    %c0_i32_0 = arith.constant 0 : i32
    %c0_i32_1 = arith.constant 0 : i32
    return %c0_i32, %c0_i32_0 : i32, i32
  }
  func.func @transform_7(%arg0: i32) -> (i32, i32) {
    %c0_i32 = arith.constant 0 : i32
    %c0_i32_0 = arith.constant 0 : i32
    return %arg0, %c0_i32 : i32, i32
  }
}

</mosaic_0001>

<bundles_post_ra>
// kernel: tpu_custom_call.1
= control target key start
LH: loop header
LB: loop body
LE: loop exit
PB: predicated region body
PF: predicated region fallthrough
CT: control target
= control target key end

     0   :  { %12 = vsyncpa [#allocation3], 0  ;;  %s542_s0 = inlined_call_operand.hbm [shape: f32[2,8], index: 0, kind: input, shape index: {}]   ;;  %s543_s1 = inlined_call_operand.vmem [shape: f32[8,32], index: 1, kind: input, shape index: {}]   ;;  %s544_s2 = inlined_call_operand.vmem [shape: f32[1,32], index: 2, kind: input, shape index: {}]   ;;  %s545_s3 = inlined_call_operand.vmem [shape: f32[32,32], index: 3, kind: input, shape index: {}]   ;;  %s546_s4 = inlined_call_operand.hbm [shape: f32[1,32], index: 4, kind: input, shape index: {}]   ;;  %s547_s5 = inlined_call_operand.vmem [shape: f32[32,4], index: 5, kind: input, shape index: {}]   ;;  %s548_s6 = inlined_call_operand.vmem [shape: f32[1,4], index: 6, kind: input, shape index: {}]   ;;  %s549_s7 = inlined_call_operand.hbm [shape: f32[2,4], index: 7, kind: output, shape index: {}]  }
   0x1   :  { %13 = vsyncpa [#allocation6], 0 }
   0x2   :  { %14 = vsyncpa [#allocation4], 0 }
   0x3   :  { %19 = vsyncadd [#allocation3], 96  ;;  %s445_s24 = smov [#allocation2]  }
   0x4   :  { %s20_s25 = sshll.u32 %s445_s24, 4  ;;  %s21_s25 = int_to_ptr.vmem [resolvable:$true] %s20_s25 }
   0x5   :  { %s387_s26 = scalar_lea.vmem %s21_s25, 32  ;;  %s391_s27 = scalar_lea.vmem %s21_s25, 128 }
   0x6   :  { %p388_p0 = scmp.ne.s32.totalorder %s21_s25, %s387_s26  ;;  %p392_p1 = scmp.lt.s32.totalorder %s21_s25, %s21_s25 }
   0x7   :  { %p393_p2 = scmp.lt.s32.totalorder %s391_s27, %s387_s26 }
   0x9   :  { %p394_p3 = por %p393_p2, %p392_p1 }
   0xb   :  { %p395_p4 = pnand %p394_p3, %p388_p0 }
   0xd   :  { %398 = shalt.err (!%p395_p4)
}
   0xe   :  { %s446_s28 = smov 32   ;;  %s447_s29 = smov 2  }
   0xf   :  { %26 = dma.hbm_to_vmem [thread:$0]  %s542_s0, 32, %s21_s25, [#allocation3], %s446_s28, %s446_s28, %s447_s29  }
  0x10   :  { %s448_s9 = smov [#allocation5]  }
  0x11   :  { %s39_s10 = sshll.u32 %s448_s9, 4  ;;  %s40_s10 = int_to_ptr.vmem [resolvable:$true] %s39_s10 }
  0x12   :  { %s407_s11 = scalar_lea.vmem %s40_s10, 16  ;;  %s411_s12 = scalar_lea.vmem %s40_s10, 32 }
  0x13   :  { %p408_p5 = scmp.ne.s32.totalorder %s40_s10, %s407_s11  ;;  %p412_p6 = scmp.lt.s32.totalorder %s40_s10, %s40_s10 }
  0x14   :  { %p413_p7 = scmp.lt.s32.totalorder %s411_s12, %s407_s11 }
  0x16   :  { %p414_p8 = por %p413_p7, %p412_p6 }
  0x18   :  { %p415_p9 = pnand %p414_p8, %p408_p5 }
  0x1a   :  { %418 = shalt.err (!%p415_p9)
}
  0x1b   :  { %42 = dma.hbm_to_vmem [thread:$0]  %s546_s4, 16, %s40_s10, [#allocation6]  }
  0x1c   :  { %439 = dma.done.wait [#allocation3], 128  }
  0x1d   :  { %440 = vsyncadd [#allocation3], 4294967168 }
  0x1e   :  { %441 = dma.done.wait [#allocation6], 16  }
  0x1f   :  { %442 = vsyncadd [#allocation6], 4294967280  ;;  %v449_v0 = vmov 0.0   ;;  %vm450_vm0 = vmmov 0   ;;  %vm62_vm1 = vcmask 64512   ;;  %v54_v1 = vld [vmem:[%s543_s1] sm:$0xff] }
  0x20   :  { %345 = vmatprep.subr.mxu0 %v449_v0  ;;  %347 = vmatprep.mubr.msk.f32.mxu0 %vm450_vm0, %v449_v0  ;;  %v53_v2 = vld [vmem:[#allocation2] sm:$0xff]  ;;  %v140_v3 = vld [vmem:[%s545_s3 + $0x18] sm:$0xff]  ;;  %v139_v4 = vld [vmem:[%s545_s3 + $0x10] sm:$0xff]  ;;  %vm148_vm2 = vcmask 261120   ;;  %vm307_vm3 = vcmask 31744  }
  0x21   :  { %350 = vmatprep.subr.mxu1 %v449_v0  ;;  %358 = vmatprep.mubr.msk.f32.mxu1 %vm450_vm0, %v449_v0  ;;  %v138_v5 = vld [vmem:[%s545_s3 + $0x8] sm:$0xff]  ;;  %v137_v6 = vld [vmem:[%s545_s3] sm:$0xff]  ;;  %v226_v7 = vld [vmem:[%s547_s5 + $0x18] sm:$0xff] }
  0x22   :  { %346 = vmatpush3.msra.mxu0 %v54_v1  ;;  %351 = vmatpush3.msra.mxu1 %v140_v3  ;;  %v327_v8 = vld [vmem:[%s544_s2] ss:$0 sm:$0xff]  ;;  %v225_v13 = vld [vmem:[%s547_s5 + $0x10] sm:$0xff]  ;;  %v224_v14 = vld [vmem:[%s547_s5 + $0x8] sm:$0xff] }
  0x23   :  { %348 = vmatmul.mubr.msk.f32.vlgmr.msra.gmra.mxu0 %vm62_vm1, %v53_v2  ;;  %352 = vmatprep.subr.mxu1 %v449_v0  ;;  %v223_v15 = vld [vmem:[%s547_s5] sm:$0xff]  ;;  %v329_v16 = vld [vmem:[#allocation5] ss:$0 sm:$0xff] }
  0x24   :  { %361 = vmatprep.subr.mxu0 %v449_v0  ;;  %369 = vmatprep.mubr.msk.f32.mxu0 %vm450_vm0, %v449_v0  ;;  %v331_v21 = vld [vmem:[%s548_s6] ss:$0 sm:$0xff] }
  0x25   :  { %353 = vmatpush3.msra.mxu1 %v139_v4  ;;  %362 = vmatpush3.msra.mxu0 %v226_v7 }
  0x26   :  { %354 = vmatprep.subr.mxu1 %v449_v0  ;;  %363 = vmatprep.subr.mxu0 %v449_v0 }
  0x27   :  { %355 = vmatpush3.msra.mxu1 %v138_v5  ;;  %364 = vmatpush3.msra.mxu0 %v225_v13 }
  0x28   :  { %356 = vmatprep.subr.mxu1 %v449_v0  ;;  %365 = vmatprep.subr.mxu0 %v449_v0 }
  0x29   :  { %357 = vmatpush3.msra.mxu1 %v137_v6  ;;  %366 = vmatpush3.msra.mxu0 %v224_v14 }
  0x2a   :  { %367 = vmatprep.subr.mxu0 %v449_v0 }
  0x2b   :  { %368 = vmatpush3.msra.mxu0 %v223_v15 }
  0xe3   :  { %v132_v9 = vpop.f32.mrf.mxu0 }
  0xe4   :  { %v133_v10 = vadd.f32 %v327_v8, %v132_v9 }
  0xe5   :  { %v349_v11 = vpop.f32.mrf.mxu0 }
  0xe6   :  { %v136_v12 = vmax.f32 %v133_v10, 0.0 }
  0xe8   :  { %359 = vmatmul.mubr.msk.f32.vlgmr.msra.gmra.mxu1 %vm148_vm2, %v136_v12 }
 0x1a8   :  { %v218_v17 = vpop.f32.mrf.mxu1 }
 0x1a9   :  { %v219_v18 = vadd.f32 %v329_v16, %v218_v17 }
 0x1aa   :  { %v360_v19 = vpop.f32.mrf.mxu1 }
 0x1ab   :  { %v222_v20 = vmax.f32 %v219_v18, 0.0 }
 0x1ad   :  { %370 = vmatmul.mubr.msk.f32.vlgmr.msra.gmra.mxu0 %vm148_vm2, %v222_v20 }
 0x26d   :  { %v303_v22 = vpop.f32.mrf.mxu0 }
 0x26e   :  { %v304_v23 = vadd.f32 %v331_v21, %v303_v22 }
 0x26f   :  { %v371_v24 = vpop.f32.mrf.mxu0 }
 0x270   :  { %308 = vst.msk [vmem:[#allocation7] sm:$0xff] %vm307_vm3, %v304_v23 }
 0x271   :  { %313 = vsyncadd [#allocation4], 96  ;;  %s451_s11 = smov [#allocation7]  }
 0x272   :  { %s314_s5 = sshll.u32 %s451_s11, 4  ;;  %s315_s5 = int_to_ptr.vmem [resolvable:$true] %s314_s5 }
 0x273   :  { %s419_s12 = scalar_lea.vmem %s315_s5, 32  ;;  %s423_s13 = scalar_lea.vmem %s315_s5, 128 }
 0x274   :  { %p420_p10 = scmp.ne.s32.totalorder %s315_s5, %s419_s12  ;;  %p424_p11 = scmp.lt.s32.totalorder %s315_s5, %s315_s5 }
 0x275   :  { %p425_p12 = scmp.lt.s32.totalorder %s423_s13, %s419_s12 }
 0x277   :  { %p426_p13 = por %p425_p12, %p424_p11 }
 0x279   :  { %p427_p0 = pnand %p426_p13, %p420_p10 }
 0x27b   :  { %430 = shalt.err (!%p427_p0)
}
 0x27c   :  { %320 = dma.vmem_to_hbm [thread:$0]  %s315_s5, 32, %s549_s7, [#allocation4], %s446_s28, %s446_s28, %s447_s29  }
 0x27d   :  { %443 = dma.done.wait [#allocation4], 128  }
 0x27e   :  { %444 = vsyncadd [#allocation4], 4294967168 }
 0x27f   :  { %324 = vsyncpa [#allocation3], 1 }
 0x280   :  { %325 = vsyncpa [#allocation6], 1 }
 0x281   :  { %326 = vsyncpa [#allocation4], 1 }

</bundles_post_ra>
